<compile_context>
chip_gen: v7x
topology: tpu7x:2x2x1
jax: 0.10.0
libtpu: 0.0.40
codegen_flags: <defaults>
</compile_context>

<pallas_src>
import jax
import jax.numpy as jnp
from jax.experimental import pallas as pl
from jax.experimental.pallas import tpu as pltpu

HIDDEN = 128


def mlp_kernel(xt_ref,
               w1t_ref,
               w2t_ref, b2_ref,
               w3t_ref, b3_ref,
               w4t_ref, b4_ref,
               ot_ref):
    # All activations are feature-major: (features, tile_b).  Batch is the lane axis,
    # so every DMA / store is lane-dense and every layer is a single MXU matmul.

    # Layer 1: Linear(in -> H) + ReLU.  Bias folded into the matmul via the constant-1
    # row of the padded input, so there is no separate bias broadcast/add.
    h = jnp.dot(w1t_ref[...], xt_ref[...], preferred_element_type=jnp.float32)
    h = jnp.maximum(h.astype(jnp.bfloat16), 0.0)

    # Layers 2 & 3: Linear(H -> H) + ReLU, bf16 MXU operands / f32 accumulation,
    # bias + ReLU kept in bf16 (half the vregs on v6e/v7x VPUs).
    h = jnp.dot(w2t_ref[...], h, preferred_element_type=jnp.float32)
    h = jnp.maximum(h.astype(jnp.bfloat16) + b2_ref[...], 0.0)
    h = jnp.dot(w3t_ref[...], h, preferred_element_type=jnp.float32)
    h = jnp.maximum(h.astype(jnp.bfloat16) + b3_ref[...], 0.0)

    # Output layer on the MXU as well (rows zero-padded to a sublane multiple);
    # store is a full-vreg, lane-dense (out_pad, tile_b) write.
    o = jnp.dot(w4t_ref[...], h, preferred_element_type=jnp.float32)
    ot_ref[...] = (o + b4_ref[...]).astype(ot_ref.dtype)


def _cdiv(a, b):
    return (a + b - 1) // b


def _round_up(a, m):
    return _cdiv(a, m) * m


def mlp_pallas(x, params, *, tile_b=4096):
    """x: (B, input_dim) float32. params: list of (W (in,out), b (out,)) per layer."""
    B, in_dim = x.shape
    (w1, b1), (w2, b2), (w3, b3), (w4, b4) = params
    hidden = w1.shape[1]
    out_dim = w4.shape[1]

    in_pad = _round_up(in_dim + 1, 8)      # +1 row carries the constant 1 (bias folding)
    out_pad = _round_up(out_dim, 8)        # output rows padded to a sublane multiple

    # One-time weight prep (tiny, ~100 KiB total).  Everything feature-major (transposed).
    w1t = (jnp.zeros((hidden, in_pad), jnp.float32)
           .at[:, :in_dim].set(w1.T)
           .at[:, in_dim].set(b1)).astype(jnp.bfloat16)
    w2t = w2.T.astype(jnp.bfloat16)
    b2c = b2.reshape(hidden, 1).astype(jnp.bfloat16)
    w3t = w3.T.astype(jnp.bfloat16)
    b3c = b3.reshape(hidden, 1).astype(jnp.bfloat16)
    w4t = (jnp.zeros((out_pad, hidden), jnp.float32)
           .at[:out_dim, :].set(w4.T)).astype(jnp.bfloat16)
    b4c = jnp.zeros((out_pad, 1), jnp.float32).at[:out_dim, 0].set(b4)

    # Balanced batch tiles: pick the tile from a target tile count (no ~2x padded work
    # when B is just above tile_b), always an even number of >= 2 grid steps so the
    # "parallel" batch axis can shard across v7x's two TensorCores.
    num_tiles = max(2, _cdiv(B, tile_b))
    num_tiles += num_tiles % 2
    tb = _round_up(_cdiv(B, num_tiles), 128)
    bp = num_tiles * tb

    # Lane-dense input: x transposed to (in_pad, Bp); batch is the lane axis.
    xt = (jnp.zeros((in_pad, bp), jnp.bfloat16)
          .at[:in_dim, :B].set(x.T.astype(jnp.bfloat16))
          .at[in_dim, :].set(1.0))

    def resident(shape):
        # Constant index_map -> block DMA'd once, stays VMEM-resident across the grid.
        # (Double-buffering these ~100 KiB of weights is negligible VMEM waste.)
        return pl.BlockSpec(shape, lambda i: (0, 0))

    out_t = pl.pallas_call(
        mlp_kernel,
        out_shape=jax.ShapeDtypeStruct((out_pad, bp), jnp.float32),
        grid_spec=pltpu.PrefetchScalarGridSpec(
            num_scalar_prefetch=0,
            grid=(num_tiles,),
            in_specs=[
                pl.BlockSpec((in_pad, tb), lambda i: (0, i)),        # x tile (lane-dense)
                resident((hidden, in_pad)),                           # layer 1 (bias folded)
                resident((hidden, hidden)), resident((hidden, 1)),    # layer 2
                resident((hidden, hidden)), resident((hidden, 1)),    # layer 3
                resident((out_pad, hidden)), resident((out_pad, 1)),  # output layer
            ],
            out_specs=pl.BlockSpec((out_pad, tb), lambda i: (0, i)),  # lane-dense output
        ),
        compiler_params=pltpu.CompilerParams(
            dimension_semantics=("parallel",),      # v7x: shard batch tiles over both TCs
            vmem_limit_bytes=48 * 1024 * 1024,      # room for big tiles, < v7x 64 MiB phys
        ),
    )(xt, w1t, w2t, b2c, w3t, b3c, w4t, b4c)

    return out_t[:out_dim, :B].T


def init_params(key, input_dim=2, output_dim=1, hidden_dim=128, num_layers=3):
    """Deterministic uniform init (PyTorch-Linear-style bounds), weights as (in, out)."""
    dims = [input_dim] + [hidden_dim] * num_layers + [output_dim]
    params = []
    for i in range(len(dims) - 1):
        fan_in, fan_out = dims[i], dims[i + 1]
        key, kw, kb = jax.random.split(key, 3)
        bound = 1.0 / jnp.sqrt(fan_in)
        w = jax.random.uniform(kw, (fan_in, fan_out), jnp.float32, -bound, bound)
        b = jax.random.uniform(kb, (fan_out,), jnp.float32, -bound, bound)
        params.append((w, b))
    return params


def mlp_ref(x, params):
    h = x
    for i, (w, b) in enumerate(params):
        h = h @ w + b
        if i < len(params) - 1:
            h = jnp.maximum(h, 0.0)
    return h


if __name__ == "__main__":
    key = jax.random.PRNGKey(0)
    key, kx = jax.random.split(key)

    B, INPUT_DIM, OUTPUT_DIM = 64, 2, 1
    x = jax.random.normal(kx, (B, INPUT_DIM), jnp.float32)
    params = init_params(key, input_dim=INPUT_DIM, output_dim=OUTPUT_DIM,
                         hidden_dim=HIDDEN, num_layers=3)

    out = jax.block_until_ready(mlp_pallas(x, params))
    ref = mlp_ref(x, params)

    assert out.shape == (B, OUTPUT_DIM), out.shape
    # Tolerance relaxed for bf16 MXU matmuls (f32 accumulation).
    assert jnp.allclose(out, ref, atol=3e-2, rtol=3e-2), (out, ref)

    print("KERNEL_OK")
</pallas_src>

<mosaic_0001>
module attributes {stable_mosaic.version = 11 : i64} {
  func.func @mlp_kernel(%arg0: i32, %arg1: memref<8x128xbf16, #tpu.memory_space<vmem>>, %arg2: memref<128x8xbf16, #tpu.memory_space<vmem>>, %arg3: memref<128x128xbf16, #tpu.memory_space<vmem>>, %arg4: memref<128x1xbf16, #tpu.memory_space<vmem>>, %arg5: memref<128x128xbf16, #tpu.memory_space<vmem>>, %arg6: memref<128x1xbf16, #tpu.memory_space<vmem>>, %arg7: memref<8x128xbf16, #tpu.memory_space<vmem>>, %arg8: memref<8x1xf32, #tpu.memory_space<vmem>>, %arg9: memref<8x128xf32, #tpu.memory_space<vmem>>) attributes {dimension_semantics = [#tpu.dimension_semantics<parallel>], iteration_bounds = array<i64: 2>, scalar_prefetch = 0 : i64, scratch_operands = 0 : i64, tpu.core_type = #tpu.core_type<tc>, window_params = [{transform_indices = @transform_0, window_bounds = array<i64: 8, 128>}, {pipeline_mode = #tpu.pipeline_mode<synchronous>, transform_indices = @transform_1, window_bounds = array<i64: 128, 8>}, {pipeline_mode = #tpu.pipeline_mode<synchronous>, transform_indices = @transform_2, window_bounds = array<i64: 128, 128>}, {pipeline_mode = #tpu.pipeline_mode<synchronous>, transform_indices = @transform_3, window_bounds = array<i64: 128, 1>}, {pipeline_mode = #tpu.pipeline_mode<synchronous>, transform_indices = @transform_4, window_bounds = array<i64: 128, 128>}, {pipeline_mode = #tpu.pipeline_mode<synchronous>, transform_indices = @transform_5, window_bounds = array<i64: 128, 1>}, {pipeline_mode = #tpu.pipeline_mode<synchronous>, transform_indices = @transform_6, window_bounds = array<i64: 8, 128>}, {pipeline_mode = #tpu.pipeline_mode<synchronous>, transform_indices = @transform_7, window_bounds = array<i64: 8, 1>}, {transform_indices = @transform_8, window_bounds = array<i64: 8, 128>}]} {
    %c0 = arith.constant 0 : index
    %c0_0 = arith.constant 0 : index
    %0 = vector.load %arg2[%c0, %c0_0] : memref<128x8xbf16, #tpu.memory_space<vmem>>, vector<128x8xbf16>
    %c0_1 = arith.constant 0 : index
    %c0_2 = arith.constant 0 : index
    %1 = vector.load %arg1[%c0_1, %c0_2] : memref<8x128xbf16, #tpu.memory_space<vmem>>, vector<8x128xbf16>
    %cst = arith.constant dense<0.000000e+00> : vector<128x128xf32>
    %2 = tpu.matmul %0, %1, %cst {dimension_numbers = #tpu.dot_dimension_numbers<[1], [0], [0], [1], [0, 0, 1, 1], [], []>} : vector<128x8xbf16>, vector<8x128xbf16>, vector<128x128xf32> -> vector<128x128xf32>
    %3 = arith.truncf %2 : vector<128x128xf32> to vector<128x128xbf16>
    %cst_3 = arith.constant 0.000000e+00 : bf16
    %4 = vector.broadcast %cst_3 : bf16 to vector<128x128xbf16>
    %5 = arith.maximumf %3, %4 : vector<128x128xbf16>
    %c0_4 = arith.constant 0 : index
    %c0_5 = arith.constant 0 : index
    %6 = vector.load %arg3[%c0_4, %c0_5] : memref<128x128xbf16, #tpu.memory_space<vmem>>, vector<128x128xbf16>
    %cst_6 = arith.constant dense<0.000000e+00> : vector<128x128xf32>
    %7 = tpu.matmul %6, %5, %cst_6 {dimension_numbers = #tpu.dot_dimension_numbers<[1], [0], [0], [1], [0, 0, 1, 1], [], []>} : vector<128x128xbf16>, vector<128x128xbf16>, vector<128x128xf32> -> vector<128x128xf32>
    %8 = arith.truncf %7 : vector<128x128xf32> to vector<128x128xbf16>
    %c0_7 = arith.constant 0 : index
    %c0_8 = arith.constant 0 : index
    %9 = vector.load %arg4[%c0_7, %c0_8] : memref<128x1xbf16, #tpu.memory_space<vmem>>, vector<128x1xbf16>
    %10 = vector.broadcast %9 : vector<128x1xbf16> to vector<128x128xbf16>
    %11 = arith.addf %8, %10 : vector<128x128xbf16>
    %cst_9 = arith.constant 0.000000e+00 : bf16
    %12 = vector.broadcast %cst_9 : bf16 to vector<128x128xbf16>
    %13 = arith.maximumf %11, %12 : vector<128x128xbf16>
    %c0_10 = arith.constant 0 : index
    %c0_11 = arith.constant 0 : index
    %14 = vector.load %arg5[%c0_10, %c0_11] : memref<128x128xbf16, #tpu.memory_space<vmem>>, vector<128x128xbf16>
    %cst_12 = arith.constant dense<0.000000e+00> : vector<128x128xf32>
    %15 = tpu.matmul %14, %13, %cst_12 {dimension_numbers = #tpu.dot_dimension_numbers<[1], [0], [0], [1], [0, 0, 1, 1], [], []>} : vector<128x128xbf16>, vector<128x128xbf16>, vector<128x128xf32> -> vector<128x128xf32>
    %16 = arith.truncf %15 : vector<128x128xf32> to vector<128x128xbf16>
    %c0_13 = arith.constant 0 : index
    %c0_14 = arith.constant 0 : index
    %17 = vector.load %arg6[%c0_13, %c0_14] : memref<128x1xbf16, #tpu.memory_space<vmem>>, vector<128x1xbf16>
    %18 = vector.broadcast %17 : vector<128x1xbf16> to vector<128x128xbf16>
    %19 = arith.addf %16, %18 : vector<128x128xbf16>
    %cst_15 = arith.constant 0.000000e+00 : bf16
    %20 = vector.broadcast %cst_15 : bf16 to vector<128x128xbf16>
    %21 = arith.maximumf %19, %20 : vector<128x128xbf16>
    %c0_16 = arith.constant 0 : index
    %c0_17 = arith.constant 0 : index
    %22 = vector.load %arg7[%c0_16, %c0_17] : memref<8x128xbf16, #tpu.memory_space<vmem>>, vector<8x128xbf16>
    %cst_18 = arith.constant dense<0.000000e+00> : vector<8x128xf32>
    %23 = tpu.matmul %22, %21, %cst_18 {dimension_numbers = #tpu.dot_dimension_numbers<[1], [0], [0], [1], [0, 0, 1, 1], [], []>} : vector<8x128xbf16>, vector<128x128xbf16>, vector<8x128xf32> -> vector<8x128xf32>
    %c0_19 = arith.constant 0 : index
    %c0_20 = arith.constant 0 : index
    %24 = vector.load %arg8[%c0_19, %c0_20] : memref<8x1xf32, #tpu.memory_space<vmem>>, vector<8x1xf32>
    %25 = vector.broadcast %24 : vector<8x1xf32> to vector<8x128xf32>
    %26 = arith.addf %23, %25 : vector<8x128xf32>
    %c0_21 = arith.constant 0 : index
    %c0_22 = arith.constant 0 : index
    %27 = vector.load %arg9[%c0_21, %c0_22] : memref<8x128xf32, #tpu.memory_space<vmem>>, vector<8x128xf32>
    tpu.vector_store %arg9[%c0_21, %c0_22], %26 {strides = array<i32>} : memref<8x128xf32, #tpu.memory_space<vmem>>, vector<8x128xf32>,
    return
  }
  func.func @transform_0(%arg0: i32) -> (i32, i32) {
    %c0_i32 = arith.constant 0 : i32
    %c0_i32_0 = arith.constant 0 : i32
    return %c0_i32, %arg0 : i32, i32
  }
  func.func @transform_1(%arg0: i32) -> (i32, i32) {
    %c0_i32 = arith.constant 0 : i32
    %c0_i32_0 = arith.constant 0 : i32
    %c0_i32_1 = arith.constant 0 : i32
    return %c0_i32, %c0_i32_0 : i32, i32
  }
  func.func @transform_2(%arg0: i32) -> (i32, i32) {
    %c0_i32 = arith.constant 0 : i32
    %c0_i32_0 = arith.constant 0 : i32
    %c0_i32_1 = arith.constant 0 : i32
    return %c0_i32, %c0_i32_0 : i32, i32
  }
  func.func @transform_3(%arg0: i32) -> (i32, i32) {
    %c0_i32 = arith.constant 0 : i32
    %c0_i32_0 = arith.constant 0 : i32
    %c0_i32_1 = arith.constant 0 : i32
    return %c0_i32, %c0_i32_0 : i32, i32
  }
  func.func @transform_4(%arg0: i32) -> (i32, i32) {
    %c0_i32 = arith.constant 0 : i32
    %c0_i32_0 = arith.constant 0 : i32
    %c0_i32_1 = arith.constant 0 : i32
    return %c0_i32, %c0_i32_0 : i32, i32
  }
  func.func @transform_5(%arg0: i32) -> (i32, i32) {
    %c0_i32 = arith.constant 0 : i32
    %c0_i32_0 = arith.constant 0 : i32
    %c0_i32_1 = arith.constant 0 : i32
    return %c0_i32, %c0_i32_0 : i32, i32
  }
  func.func @transform_6(%arg0: i32) -> (i32, i32) {
    %c0_i32 = arith.constant 0 : i32
    %c0_i32_0 = arith.constant 0 : i32
    %c0_i32_1 = arith.constant 0 : i32
    return %c0_i32, %c0_i32_0 : i32, i32
  }
  func.func @transform_7(%arg0: i32) -> (i32, i32) {
    %c0_i32 = arith.constant 0 : i32
    %c0_i32_0 = arith.constant 0 : i32
    %c0_i32_1 = arith.constant 0 : i32
    return %c0_i32, %c0_i32_0 : i32, i32
  }
  func.func @transform_8(%arg0: i32) -> (i32, i32) {
    %c0_i32 = arith.constant 0 : i32
    %c0_i32_0 = arith.constant 0 : i32
    return %c0_i32, %arg0 : i32, i32
  }
}

</mosaic_0001>

<bundles_post_ra>
// kernel: tpu_custom_call.1
= control target key start
LH: loop header
LB: loop body
LE: loop exit
PB: predicated region body
PF: predicated region fallthrough
CT: control target
= control target key end

     0   :  { %13 = vsyncpa [#allocation3], 0  ;;  %s2249_s0 = inlined_call_operand.vmem [shape: bf16[8,256], index: 0, kind: input, shape index: {}]   ;;  %s2250_s1 = inlined_call_operand.vmem [shape: bf16[128,8], index: 1, kind: input, shape index: {}]   ;;  %s2251_s2 = inlined_call_operand.vmem [shape: bf16[128,128], index: 2, kind: input, shape index: {}]   ;;  %s2252_s3 = inlined_call_operand.vmem [shape: bf16[128,1], index: 3, kind: input, shape index: {}]   ;;  %s2253_s4 = inlined_call_operand.vmem [shape: bf16[128,128], index: 4, kind: input, shape index: {}]   ;;  %s2254_s5 = inlined_call_operand.vmem [shape: bf16[128,1], index: 5, kind: input, shape index: {}]   ;;  %s2255_s6 = inlined_call_operand.vmem [shape: bf16[8,128], index: 6, kind: input, shape index: {}]   ;;  %s2256_s7 = inlined_call_operand.vmem [shape: f32[8,1], index: 7, kind: input, shape index: {}]   ;;  %s2257_s8 = inlined_call_operand.hbm [shape: f32[8,256], index: 8, kind: output, shape index: {}]  }
   0x1   :  { %15 = vsyncpa [#allocation3 + $0x1], 0  ;;  %s1898_s27 = smov 0   ;;  %s1900_s28 = smov 0  }
   0x2   :  { %s1902_s29 = smov 0   ;;  %s1904_s30 = smov 0  }
   0x3 LB: > { %s1919_s9 = sadd.s32 4294967295, %s1846_s30   ;;  %s1504_s10 = sadd.s32 4294967294, %s1846_s30   ;;  %s1846_s30 = sphi %s1904_s30, %s2263_s30   ;;  %s1842_s29 = sphi %s1902_s29, %s2262_s29   ;;  %s1838_s28 = sphi %s1900_s28, %s2261_s28   ;;  %s1834_s27 = sphi %s1898_s27, %s2260_s27  }
   0x4   : > { %s1923_s11 = sadd.s32 1, %s1846_s30   ;;  %s201_s12 = sadd.s32 1, %s1842_s29 }
   0x5   : > { %s198_s13 = ssub.s32 %s1846_s30, %s1923_s11  ;;  %p211_p0 = scmp.ne.s32.totalorder %s1842_s29, %s1838_s28 }
   0x6   : > { %p199_p1 = scmp.eq.s32.totalorder %s198_s13, 0  ;;  %p212_p2 = scmp.eq.s32.totalorder %s1919_s9, 1 }
   0x7   : > { %p217_p3 = scmp.ne.s32.totalorder %s1838_s28, %s1834_s27  ;;  %p218_p4 = scmp.eq.s32.totalorder %s1504_s10, 1 }
   0x8   : > { %s1934_s14 = scalar_select %p199_p1, %s1842_s29, %s201_s12  }
   0x9   : > { %p1936_p5 = por %p212_p2, %p211_p0  ;;  %p1940_p6 = por %p218_p4, %p217_p3 }
   0xa   : > { %p1507_p7 = scmp.ge.s32.totalorder %s1846_s30, 1  ;;  %p264_p8 = scmp.lt.s32.totalorder %s1846_s30, 3 }
   0xc   : > { %p265_p9 = pnand %p1507_p7, %p264_p8 }
   0xd   : > { %p297_p10 = scmp.lt.s32.totalorder (!%p265_p9), %s1919_s9, 1  ;;  %v1760_v0 = vld [vmem:[%s2250_s1] sm:$0xff] (!%p265_p9)   ;;  %vm359_vm0 = vcmask (!%p265_p9), 64512   ;;  %vm384_vm1 = vcmask (!%p265_p9), 1043456   ;;  %v1761_v3 = vld [vmem:[%s2250_s1 + $0x8] sm:$0xff] (!%p265_p9)   ;;  %v1762_v4 = vld [vmem:[%s2250_s1 + $0x10] sm:$0xff] (!%p265_p9)  }
   0xe   : > { %268 = sbr.rel (%p265_p9) target bundleno = 1014 (0x3f6), region = 52  ;;  %1614 = vmatprep.mubr.msk.bf16.mxu0 (!%p265_p9), %vm359_vm0, %v1760_v0  ;;  %v1763_v5 = vld [vmem:[%s2250_s1 + $0x18] sm:$0xff] (!%p265_p9)   ;;  %v1764_v6 = vld [vmem:[%s2250_s1 + $0x20] sm:$0xff] (!%p265_p9)   ;;  %v1765_v7 = vld [vmem:[%s2250_s1 + $0x28] sm:$0xff] (!%p265_p9)   ;;  %v1848_v10 = vmov (!%p265_p9), 0   ;;  %vm1851_vm2 = vmmov (!%p265_p9), 0  }
   0xf   : > { %v1766_v8 = vld [vmem:[%s2250_s1 + $0x30] sm:$0xff] (!%p265_p9)   ;;  %v1767_v9 = vld [vmem:[%s2250_s1 + $0x38] sm:$0xff] (!%p265_p9)   ;;  %1758 = vset.pattern.permute.xlu0 (!%p265_p9), %v1848_v10  ;;  %1759 = vset.pattern.permute.xlu1 (!%p265_p9), %v1848_v10  ;;  %v1768_v11 = vld [vmem:[%s2251_s2] sm:$0xff] (!%p265_p9)   ;;  %s294_s21 = sand.u32 (!%p265_p9), 1, %s1838_s28   ;;  %s1852_s17 = smov (!%p265_p9), [#allocation2]  }
  0x10   : > { %1646 = vmatprep.mubr.bf16.mxu1 (!%p265_p9), %v1768_v11  ;;  %v670_v12 = vld [vmem:[%s2252_s3] sm:$0xf] (!%p265_p9)  ;;  %v672_v13 = vld [vmem:[%s2252_s3 + $0x8] sm:$0xf] (!%p265_p9)  ;;  %v671_v14 = vld [vmem:[%s2252_s3 + $0x4] sm:$0xf] (!%p265_p9) }
  0x11   : > { %688 = vperm.xlu0 (!%p265_p9), %1758, %v670_v12   ;;  %712 = vperm.xlu1 (!%p265_p9), %1759, %v672_v13   ;;  %v673_v15 = vld [vmem:[%s2252_s3 + $0xc] sm:$0xf] (!%p265_p9)  ;;  %v674_v16 = vld [vmem:[%s2252_s3 + $0x10] sm:$0xf] (!%p265_p9)  ;;  %v675_v17 = vld [vmem:[%s2252_s3 + $0x14] sm:$0xf] (!%p265_p9) }
  0x12   : > { %v676_v18 = vld [vmem:[%s2252_s3 + $0x18] sm:$0xf] (!%p265_p9)  ;;  %v677_v19 = vld [vmem:[%s2252_s3 + $0x1c] sm:$0xf] (!%p265_p9)  ;;  %v678_v20 = vld [vmem:[%s2252_s3 + $0x20] sm:$0xf] (!%p265_p9) }
  0x13   : > { %v679_v21 = vld [vmem:[%s2252_s3 + $0x24] sm:$0xf] (!%p265_p9)  ;;  %v680_v22 = vld [vmem:[%s2252_s3 + $0x28] sm:$0xf] (!%p265_p9)  ;;  %v681_v23 = vld [vmem:[%s2252_s3 + $0x2c] sm:$0xf] (!%p265_p9) }
  0x14   : > { %v682_v24 = vld [vmem:[%s2252_s3 + $0x30] sm:$0xf] (!%p265_p9)  ;;  %v683_v25 = vld [vmem:[%s2252_s3 + $0x34] sm:$0xf] (!%p265_p9)  ;;  %v684_v26 = vld [vmem:[%s2252_s3 + $0x38] sm:$0xf] (!%p265_p9) }
  0x15   : > { %s298_s19 = scalar_select %p297_p10, %s1919_s9, 1  ;;  %700 = vperm.xlu0 %1758, %v671_v14   ;;  %724 = vperm.xlu1 %1759, %v673_v15   ;;  %v685_v27 = vld [vmem:[%s2252_s3 + $0x3c] sm:$0xf]  ;;  %v1111_v28 = vld [vmem:[%s2254_s5] sm:$0xf]  ;;  %v1769_v14 = vld [vmem:[%s2251_s2 + $0x8] sm:$0xff]  }
  0x16   : > { %v1112_v29 = vld [vmem:[%s2254_s5 + $0x4] sm:$0xf]  ;;  %v1113_v30 = vld [vmem:[%s2254_s5 + $0x8] sm:$0xf]  ;;  %v1114_v31 = vld [vmem:[%s2254_s5 + $0xc] sm:$0xf] }
  0x17   : > { %s1509_s20 = sshll.u32 %s298_s19, 2  ;;  %v1115_v32 = vld [vmem:[%s2254_s5 + $0x10] sm:$0xf]  ;;  %v1116_v33 = vld [vmem:[%s2254_s5 + $0x14] sm:$0xf]  ;;  %v1384_v44 = vld [vmem:[%s2256_s7] sm:$0xff] }
  0x18   : > { %s300_s23 = scalar_lea.vmem %s2249_s0, %s1509_s20  ;;  %v1117_v34 = vld [vmem:[%s2254_s5 + $0x18] sm:$0xf]  ;;  %v1118_v35 = vld [vmem:[%s2254_s5 + $0x1c] sm:$0xf]  ;;  %v1119_v36 = vld [vmem:[%s2254_s5 + $0x20] sm:$0xf] }
  0x19   : > { %v318_v1 = vld [vmem:[%s300_s23] sm:$0xf]  ;;  %736 = vperm.xlu0 %1758, %v674_v16   ;;  %748 = vperm.xlu1 %1759, %v675_v17   ;;  %v1120_v37 = vld [vmem:[%s2254_s5 + $0x24] sm:$0xf]  ;;  %v1121_v38 = vld [vmem:[%s2254_s5 + $0x28] sm:$0xf] }
  0x1a   : > { %1714 = vmatprep.subr.msk.bf16.mxu0 %vm384_vm1, %v318_v1  ;;  %v386_v2 = vsel %vm384_vm1, %v318_v1, 0  ;;  %v1122_v39 = vld [vmem:[%s2254_s5 + $0x2c] sm:$0xf]  ;;  %v1123_v40 = vld [vmem:[%s2254_s5 + $0x30] sm:$0xf]  ;;  %v1771_v16 = vld [vmem:[%s2251_s2 + $0x18] sm:$0xff]  }
  0x1b   : > { %1613 = vmatpush3.bf16.msra.mxu0 %v386_v2  ;;  %v1124_v41 = vld [vmem:[%s2254_s5 + $0x34] sm:$0xf]  ;;  %v1125_v42 = vld [vmem:[%s2254_s5 + $0x38] sm:$0xf]  ;;  %v1126_v43 = vld [vmem:[%s2254_s5 + $0x3c] sm:$0xf] }
  0x1c   : > { %v1770_v15 = vld [vmem:[%s2251_s2 + $0x10] sm:$0xff]   ;;  %v1772_v17 = vld [vmem:[%s2251_s2 + $0x20] sm:$0xff]   ;;  %s1508_s22 = sshll.u32 %s294_s21, 3  ;;  %s1559_s23 = sshll.u32 %s1919_s9, 7 }
  0x1d   : > { %760 = vperm.xlu0 %1758, %v676_v18   ;;  %772 = vperm.xlu1 %1759, %v677_v19   ;;  %v1773_v18 = vld [vmem:[%s2251_s2 + $0x28] sm:$0xff]   ;;  %v1774_v19 = vld [vmem:[%s2251_s2 + $0x30] sm:$0xff]   ;;  %s296_s24 = scalar_lea.vmem [#allocation2], %s1508_s22  ;;  %s2207_s12 = scalar_lea.hbm %s2257_s8, %s1559_s23 }
  0x1e   : > { %1615 = vmatmul.mubr.msk.bf16.vlgmr.msra.gmra.mrb[0].mxu0 %vm359_vm0, %v1761_v3  ;;  %s1445_s25 = sshll.u32 %s296_s24, 4  ;;  %s1432_s9 = scalar_lea.sflag [#allocation3], %s294_s21  ;;  %s2209_s25 = int_to_ptr.vmem [resolvable:$true] %s1445_s25 }
  0x1f   : > { %1618 = vmatprep.mubr.msk.bf16.mxu0 %vm359_vm0, %v1762_v4  ;;  %s1784_s13 = scalar_lea.vmem %s2209_s25, 128  ;;  %s1788_s18 = sshll.u32 %s1852_s17, 4  ;;  %s1789_s18 = int_to_ptr.vmem [resolvable:$false] %s1788_s18 }
  0x20   : > { %p1785_p11 = scmp.ne.s32.totalorder %s2209_s25, %s1784_s13  ;;  %s1790_s19 = scalar_lea.vmem %s1789_s18, 256 }
  0x21   : > { %784 = vperm.xlu0 %1758, %v678_v20   ;;  %796 = vperm.xlu1 %1759, %v679_v21   ;;  %v1775_v20 = vld [vmem:[%s2251_s2 + $0x38] sm:$0xff]   ;;  %v1776_v21 = vld [vmem:[%s2253_s4] sm:$0xff]   ;;  %p1791_p0 = scmp.lt.s32.totalorder %s2209_s25, %s1789_s18  ;;  %p1792_p1 = scmp.lt.s32.totalorder %s1790_s19, %s1784_s13 }
  0x22   : > { %p1786_p12 = pnand %p1785_p11, %p1936_p5 }
  0x23   : > { %p1793_p2 = por %p1792_p1, %p1791_p0 }
  0x24   : > { %p1787_p13 = pneg %p1786_p12 }
  0x25   : > { %808 = vperm.xlu0 %1758, %v680_v22   ;;  %820 = vperm.xlu1 %1759, %v681_v23  }
  0x26   : > { %1619 = vmatmul.mubr.msk.bf16.gmra.mrb[4].mxu0 %vm359_vm0, %v1763_v5  ;;  %p1794_p3 = pnand %p1793_p2, %p1787_p13 }
  0x27   : > { %1622 = vmatprep.mubr.msk.bf16.mxu0 %vm359_vm0, %v1764_v6 }
  0x29   : > { %832 = vperm.xlu0 %1758, %v682_v24   ;;  %844 = vperm.xlu1 %1759, %v683_v25  }
  0x2d   : > { %856 = vperm.xlu0 %1758, %v684_v26   ;;  %868 = vperm.xlu1 %1759, %v685_v27   ;;  %v1849_v26 = vmov 839922192  }
  0x2e   : > { %1623 = vmatmul.mubr.msk.bf16.gmra.mrb[8].mxu0 %vm359_vm0, %v1765_v7  ;;  %v692_v27 = vunpack.c.l.s4 %v1849_v26 }
  0x2f   : > { %1626 = vmatprep.mubr.msk.bf16.mxu0 %vm359_vm0, %v1766_v8 }
  0x31   : > { %1129 = vperm.xlu0 %1758, %v1111_v28   ;;  %1141 = vperm.xlu1 %1759, %v1112_v29   ;;  %v694_v28 = vlaneseq  ;;  %v693_v29 = vunpack.c.0.s8 %v692_v27 }
  0x35   : > { %1153 = vperm.xlu0 %1758, %v1113_v30   ;;  %1165 = vperm.xlu1 %1759, %v1114_v31   ;;  %v695_v30 = vshrl.u32 %v694_v28, 7 }
  0x36   : > { %1627 = vmatmul.mubr.msk.bf16.gmra.mrb[12].mxu0 %vm359_vm0, %v1767_v9 }
  0x37   : > { %1678 = vmatprep.mubr.bf16.mxu0 %v1776_v21 }
  0x39   : > { %1177 = vperm.xlu0 %1758, %v1115_v32   ;;  %1189 = vperm.xlu1 %1759, %v1116_v33   ;;  %v2119_v33 = vsub.s32 %v693_v29, %v695_v30 }
  0x3d   : > { %1201 = vperm.xlu0 %1758, %v1117_v34   ;;  %1213 = vperm.xlu1 %1759, %v1118_v35  }
  0x41   : > { %1225 = vperm.xlu0 %1758, %v1119_v36   ;;  %1237 = vperm.xlu1 %1759, %v1120_v37  }
  0x45   : > { %1249 = vperm.xlu0 %1758, %v1121_v38   ;;  %1261 = vperm.xlu1 %1759, %v1122_v39  }
  0x49   : > { %1273 = vperm.xlu0 %1758, %v1123_v40   ;;  %1285 = vperm.xlu1 %1759, %v1124_v41  }
  0x4d   : > { %1297 = vperm.xlu0 %1758, %v1125_v42   ;;  %1309 = vperm.xlu1 %1759, %v1126_v43  }
  0x51   : > { %1387 = vperm.xlu0 %1758, %v1384_v44  }
  0x90   : > { %v689_v22 = vpop.permute.xlu0 %688  ;;  %v713_v23 = vpop.permute.xlu1 %712 }
  0x91   : > { %v721_v34 = vrot.slane %v713_v23, %v2119_v33  ;;  %v697_v38 = vrot.slane %v689_v22, %v2119_v33 }
  0x94   : > { %v701_v24 = vpop.permute.xlu0 %700  ;;  %v725_v25 = vpop.permute.xlu1 %724 }
  0x95   : > { %v733_v35 = vrot.slane %v725_v25, %v2119_v33  ;;  %v709_v39 = vrot.slane %v701_v24, %v2119_v33 }
  0x97   : > { %v1535_v42 = vcombine.low %v721_v34, %v733_v35 }
  0x98   : > { %v737_v31 = vpop.permute.xlu0 %736  ;;  %v749_v32 = vpop.permute.xlu1 %748 }
  0x9c   : > { %v761_v36 = vpop.permute.xlu0 %760  ;;  %v773_v37 = vpop.permute.xlu1 %772 }
  0xf1   : > { %v1616_v45 = vpop.f32.mrb[0].mxu0 }
  0xf2   : > { %v422_v46 = vpop.f32.mrb[1].mxu0 }
  0xf3   : > { %v1617_v47 = vpop.f32.mrb[2].mxu0 }
  0xf4   : > { %v486_v48 = vpack.c.bf16 %v1617_v47, %v1616_v45  ;;  %v425_v49 = vpop.f32.mrb[3].mxu0  ;;  %v785_v47 = vpop.permute.xlu0 %784 }
  0xf5   : > { %v485_v50 = vpack.c.bf16 %v425_v49, %v422_v46  ;;  %v1534_v46 = vcombine.low %v697_v38, %v709_v39  ;;  %v797_v49 = vpop.permute.xlu1 %796 }
  0xf6   : > { %v494_v52 = vmax.bf16 %v1848_v10, %v486_v48 }
  0xf7   : > { %v493_v51 = vmax.bf16 %v1848_v10, %v485_v50 }
  0xf9   : > { %v1620_v53 = vpop.f32.mrb[4].mxu0  ;;  %1630 = vmatprep.subr.bf16.mxu1 %v493_v51 }
  0xfa   : > { %v438_v54 = vpop.f32.mrb[5].mxu0  ;;  %1631 = vmatpush3.bf16.msra.mxu1 %v493_v51 }
  0xfb   : > { %v1621_v55 = vpop.f32.mrb[6].mxu0  ;;  %1632 = vmatprep.subr.bf16.mxu1 %v494_v52 }
  0xfc   : > { %v488_v56 = vpack.c.bf16 %v1621_v55, %v1620_v53  ;;  %v441_v57 = vpop.f32.mrb[7].mxu0  ;;  %v757_v53 = vrot.slane %v749_v32, %v2119_v33  ;;  %v781_v55 = vrot.slane %v773_v37, %v2119_v33 }
  0xfd   : > { %v487_v58 = vpack.c.bf16 %v441_v57, %v438_v54  ;;  %v769_v54 = vrot.slane %v761_v36, %v2119_v33 }
  0xfe   : > { %1633 = vmatpush3.bf16.msra.mxu1 %v494_v52  ;;  %v496_v60 = vmax.bf16 %v1848_v10, %v488_v56  ;;  %v745_v52 = vrot.slane %v737_v31, %v2119_v33 }
  0xff   : > { %v495_v59 = vmax.bf16 %v1848_v10, %v487_v58 }
 0x101   : > { %v1624_v61 = vpop.f32.mrb[8].mxu0  ;;  %1634 = vmatprep.subr.bf16.mxu1 %v495_v59 }
 0x102   : > { %v454_v62 = vpop.f32.mrb[9].mxu0  ;;  %1635 = vmatpush3.bf16.msra.mxu1 %v495_v59  ;;  %v809_v59 = vpop.permute.xlu0 %808 }
 0x103   : > { %v1625_v63 = vpop.f32.mrb[10].mxu0  ;;  %1636 = vmatprep.subr.bf16.mxu1 %v496_v60 }
 0x104   : > { %v490_v0 = vpack.c.bf16 %v1625_v63, %v1624_v61  ;;  %v457_v1 = vpop.f32.mrb[11].mxu0 }
 0x105   : > { %v489_v2 = vpack.c.bf16 %v457_v1, %v454_v62  ;;  %v821_v62 = vpop.permute.xlu1 %820  ;;  %v1536_v1 = vcombine.low %v745_v52, %v757_v53  ;;  %v1783_v52 = vld [vmem:[%s2253_s4 + $0x38] sm:$0xff]   ;;  %v1850_v53 = vmov 0.0  }
 0x106   : > { %1637 = vmatpush3.bf16.msra.mxu1 %v496_v60  ;;  %v498_v4 = vmax.bf16 %v1848_v10, %v490_v0 }
 0x107   : > { %v497_v3 = vmax.bf16 %v1848_v10, %v489_v2  ;;  %v1537_v2 = vcombine.low %v769_v54, %v781_v55 }
 0x109   : > { %v1628_v5 = vpop.f32.mrb[12].mxu0  ;;  %1638 = vmatprep.subr.bf16.mxu1 %v497_v3 }
 0x10a   : > { %v470_v6 = vpop.f32.mrb[13].mxu0  ;;  %1639 = vmatpush3.bf16.msra.mxu1 %v497_v3 }
 0x10b   : > { %v1629_v7 = vpop.f32.mrb[14].mxu0  ;;  %1640 = vmatprep.subr.bf16.mxu1 %v498_v4 }
 0x10c   : > { %v492_v8 = vpack.c.bf16 %v1629_v7, %v1628_v5  ;;  %v473_v9 = vpop.f32.mrb[15].mxu0  ;;  %v805_v7 = vrot.slane %v797_v49, %v2119_v33  ;;  %v1780_v49 = vld [vmem:[%s2253_s4 + $0x20] sm:$0xff]  }
 0x10d   : > { %v491_v11 = vpack.c.bf16 %v473_v9, %v470_v6  ;;  %v793_v6 = vrot.slane %v785_v47, %v2119_v33  ;;  %v829_v9 = vrot.slane %v821_v62, %v2119_v33  ;;  %v1778_v47 = vld [vmem:[%s2253_s4 + $0x10] sm:$0xff]  }
 0x10e   : > { %1641 = vmatpush3.bf16.msra.mxu1 %v498_v4  ;;  %v500_v13 = vmax.bf16 %v1848_v10, %v492_v8  ;;  %v817_v8 = vrot.slane %v809_v59, %v2119_v33 }
 0x10f   : > { %v499_v12 = vmax.bf16 %v1848_v10, %v491_v11  ;;  %v833_v11 = vpop.permute.xlu0 %832 }
 0x110   : > { %v1539_v21 = vcombine.low %v817_v8, %v829_v9  ;;  %v841_v25 = vrot.slane %v833_v11, %v2119_v33 }
 0x111   : > { %1642 = vmatprep.subr.bf16.mxu1 %v499_v12 }
 0x112   : > { %1643 = vmatpush3.bf16.msra.mxu1 %v499_v12 }
 0x113   : > { %1644 = vmatprep.subr.bf16.mxu1 %v500_v13  ;;  %v857_v26 = vpop.permute.xlu0 %856 }
 0x114   : > { %v865_v29 = vrot.slane %v857_v26, %v2119_v33 }
 0x116   : > { %1645 = vmatpush3.bf16.msra.mxu1 %v500_v13 }
 0x117   : > { %1694 = vmatprep.subr.bf16.mxu1 %v1850_v53  ;;  %v1130_v55 = vpop.permute.xlu0 %1129 }
 0x119   : > { %1647 = vmatmul.mubr.bf16.vlgmr.msra.gmra.mrb[0].mxu1 %v1769_v14  ;;  %v845_v14 = vpop.permute.xlu1 %844 }
 0x11a   : > { %1650 = vmatprep.mubr.bf16.mxu1 %v1770_v15  ;;  %v853_v28 = vrot.slane %v845_v14, %v2119_v33 }
 0x11c   : > { %v1540_v39 = vcombine.low %v841_v25, %v853_v28 }
 0x11d   : > { %v869_v27 = vpop.permute.xlu1 %868 }
 0x11e   : > { %v877_v30 = vrot.slane %v869_v27, %v2119_v33 }
 0x121   : > { %1651 = vmatmul.mubr.bf16.gmra.mrb[4].mxu1 %v1771_v16  ;;  %v1142_v54 = vpop.permute.xlu1 %1141 }
 0x122   : > { %1654 = vmatprep.mubr.bf16.mxu1 %v1772_v17 }
 0x129   : > { %1655 = vmatmul.mubr.bf16.gmra.mrb[8].mxu1 %v1773_v18 }
 0x12a   : > { %1658 = vmatprep.mubr.bf16.mxu1 %v1774_v19 }
 0x131   : > { %1659 = vmatmul.mubr.bf16.gmra.mrb[12].mxu1 %v1775_v20  ;;  %v1538_v20 = vcombine.low %v793_v6, %v805_v7 }
 0x132   : > { %1710 = vmatprep.mubr.msk.bf16.mxu1 %vm1851_vm2, %v1850_v53 }
 0x1ec   : > { %v1648_v40 = vpop.f32.mrb[0].mxu1 }
 0x1ed   : > { %v599_v41 = vpop.f32.mrb[1].mxu1 }
 0x1ee   : > { %v1649_v43 = vpop.f32.mrb[2].mxu1 }
 0x1ef   : > { %v663_v44 = vpack.c.bf16 %v1649_v43, %v1648_v40  ;;  %v602_v45 = vpop.f32.mrb[3].mxu1  ;;  %v1541_v40 = vcombine.low %v865_v29, %v877_v30 }
 0x1f0   : > { %v662_v48 = vpack.c.bf16 %v602_v45, %v599_v41 }
 0x1f1   : > { %v927_v50 = vadd.bf16 %v1535_v42, %v663_v44 }
 0x1f2   : > { %v926_v51 = vadd.bf16 %v1534_v46, %v662_v48  ;;  %v1777_v46 = vld [vmem:[%s2253_s4 + $0x8] sm:$0xff]   ;;  %v1779_v48 = vld [vmem:[%s2253_s4 + $0x18] sm:$0xff]  }
 0x1f3   : > { %v935_v61 = vmax.bf16 %v1848_v10, %v927_v50  ;;  %v1781_v50 = vld [vmem:[%s2253_s4 + $0x28] sm:$0xff]  }
 0x1f4   : > { %v1652_v56 = vpop.f32.mrb[4].mxu1  ;;  %v934_v57 = vmax.bf16 %v1848_v10, %v926_v51  ;;  %v1782_v51 = vld [vmem:[%s2253_s4 + $0x30] sm:$0xff]  }
 0x1f5   : > { %v615_v58 = vpop.f32.mrb[5].mxu1 }
 0x1f6   : > { %v1653_v60 = vpop.f32.mrb[6].mxu1  ;;  %1662 = vmatprep.subr.bf16.mxu0 %v934_v57 }
 0x1f7   : > { %v665_v63 = vpack.c.bf16 %v1653_v60, %v1652_v56  ;;  %v618_v0 = vpop.f32.mrb[7].mxu1  ;;  %1663 = vmatpush3.bf16.msra.mxu0 %v934_v57  ;;  %v1166_v56 = vpop.permute.xlu1 %1165 }
 0x1f8   : > { %v664_v3 = vpack.c.bf16 %v618_v0, %v615_v58  ;;  %1664 = vmatprep.subr.bf16.mxu0 %v935_v61  ;;  %v1154_v57 = vpop.permute.xlu0 %1153  ;;  %v1138_v0 = vrot.slane %v1130_v55, %v2119_v33 }
 0x1f9   : > { %v929_v4 = vadd.bf16 %v1537_v2, %v665_v63  ;;  %v1162_v62 = vrot.slane %v1154_v57, %v2119_v33  ;;  %v1174_v63 = vrot.slane %v1166_v56, %v2119_v33 }
 0x1fa   : > { %v928_v5 = vadd.bf16 %v1536_v1, %v664_v3  ;;  %v1150_v1 = vrot.slane %v1142_v54, %v2119_v33 }
 0x1fb   : > { %1665 = vmatpush3.bf16.msra.mxu0 %v935_v61  ;;  %v937_v17 = vmax.bf16 %v1848_v10, %v929_v4  ;;  %v1190_v58 = vpop.permute.xlu1 %1189  ;;  %v1551_v6 = vcombine.low %v1162_v62, %v1174_v63 }
 0x1fc   : > { %v1656_v12 = vpop.f32.mrb[8].mxu1  ;;  %v936_v13 = vmax.bf16 %v1848_v10, %v928_v5  ;;  %v1178_v59 = vpop.permute.xlu0 %1177  ;;  %v1550_v9 = vcombine.low %v1138_v0, %v1150_v1 }
 0x1fd   : > { %v631_v15 = vpop.f32.mrb[9].mxu1 }
 0x1fe   : > { %v1657_v16 = vpop.f32.mrb[10].mxu1  ;;  %1666 = vmatprep.subr.bf16.mxu0 %v936_v13 }
 0x1ff   : > { %v667_v18 = vpack.c.bf16 %v1657_v16, %v1656_v12  ;;  %v634_v19 = vpop.f32.mrb[11].mxu1  ;;  %1667 = vmatpush3.bf16.msra.mxu0 %v936_v13  ;;  %v1214_v60 = vpop.permute.xlu1 %1213 }
 0x200   : > { %v666_v22 = vpack.c.bf16 %v634_v19, %v631_v15  ;;  %1668 = vmatprep.subr.bf16.mxu0 %v937_v17  ;;  %v1202_v61 = vpop.permute.xlu0 %1201  ;;  %v1222_v16 = vrot.slane %v1214_v60, %v2119_v33 }
 0x201   : > { %v931_v23 = vadd.bf16 %v1539_v21, %v667_v18  ;;  %v1210_v15 = vrot.slane %v1202_v61, %v2119_v33  ;;  %v1198_v18 = vrot.slane %v1190_v58, %v2119_v33 }
 0x202   : > { %v930_v24 = vadd.bf16 %v1538_v20, %v666_v22 }
 0x203   : > { %1669 = vmatpush3.bf16.msra.mxu0 %v937_v17  ;;  %v939_v36 = vmax.bf16 %v1848_v10, %v931_v23  ;;  %v1238_v4 = vpop.permute.xlu1 %1237  ;;  %v1186_v17 = vrot.slane %v1178_v59, %v2119_v33  ;;  %v1553_v25 = vcombine.low %v1210_v15, %v1222_v16 }
 0x204   : > { %v1660_v31 = vpop.f32.mrb[12].mxu1  ;;  %v938_v32 = vmax.bf16 %v1848_v10, %v930_v24  ;;  %v1226_v11 = vpop.permute.xlu0 %1225 }
 0x205   : > { %v647_v34 = vpop.f32.mrb[13].mxu1  ;;  %v1552_v28 = vcombine.low %v1186_v17, %v1198_v18 }
 0x206   : > { %v1661_v35 = vpop.f32.mrb[14].mxu1  ;;  %1670 = vmatprep.subr.bf16.mxu0 %v938_v32 }
 0x207   : > { %v669_v37 = vpack.c.bf16 %v1661_v35, %v1660_v31  ;;  %v650_v38 = vpop.f32.mrb[15].mxu1  ;;  %1671 = vmatpush3.bf16.msra.mxu0 %v938_v32  ;;  %v1262_v19 = vpop.permute.xlu1 %1261 }
 0x208   : > { %v668_v41 = vpack.c.bf16 %v650_v38, %v647_v34  ;;  %1672 = vmatprep.subr.bf16.mxu0 %v939_v36  ;;  %v1250_v23 = vpop.permute.xlu0 %1249  ;;  %v1246_v38 = vrot.slane %v1238_v4, %v2119_v33 }
 0x209   : > { %v933_v42 = vadd.bf16 %v1541_v40, %v669_v37  ;;  %v1258_v35 = vrot.slane %v1250_v23, %v2119_v33  ;;  %v1234_v37 = vrot.slane %v1226_v11, %v2119_v33 }
 0x20a   : > { %v932_v43 = vadd.bf16 %v1540_v39, %v668_v41 }
 0x20b   : > { %1673 = vmatpush3.bf16.msra.mxu0 %v939_v36  ;;  %v941_v45 = vmax.bf16 %v1848_v10, %v933_v42  ;;  %v1286_v32 = vpop.permute.xlu1 %1285  ;;  %v1270_v36 = vrot.slane %v1262_v19, %v2119_v33 }
 0x20c   : > { %v940_v44 = vmax.bf16 %v1848_v10, %v932_v43  ;;  %v1274_v39 = vpop.permute.xlu0 %1273  ;;  %v1294_v58 = vrot.slane %v1286_v32, %v2119_v33 }
 0x20d   : > { %v1282_v57 = vrot.slane %v1274_v39, %v2119_v33 }
 0x20e   : > { %1674 = vmatprep.subr.bf16.mxu0 %v940_v44 }
 0x20f   : > { %1675 = vmatpush3.bf16.msra.mxu0 %v940_v44  ;;  %v1555_v44 = vcombine.low %v1258_v35, %v1270_v36 }
 0x210   : > { %1676 = vmatprep.subr.bf16.mxu0 %v941_v45 }
 0x213   : > { %1677 = vmatpush3.bf16.msra.mxu0 %v941_v45 }
 0x216   : > { %1679 = vmatmul.mubr.bf16.vlgmr.msra.gmra.mrb[16].mxu0 %v1777_v46 }
 0x217   : > { %1682 = vmatprep.mubr.bf16.mxu0 %v1778_v47  ;;  %v1554_v47 = vcombine.low %v1234_v37, %v1246_v38 }
 0x21e   : > { %1683 = vmatmul.mubr.bf16.gmra.mrb[20].mxu0 %v1779_v48  ;;  %v1310_v48 = vpop.permute.xlu1 %1309 }
 0x21f   : > { %1686 = vmatprep.mubr.bf16.mxu0 %v1780_v49  ;;  %v1318_v56 = vrot.slane %v1310_v48, %v2119_v33 }
 0x226   : > { %1687 = vmatmul.mubr.bf16.gmra.mrb[24].mxu0 %v1781_v50 }
 0x227   : > { %1690 = vmatprep.mubr.bf16.mxu0 %v1782_v51 }
 0x22e   : > { %1691 = vmatmul.mubr.bf16.gmra.mrb[28].mxu0 %v1783_v52  ;;  %v1298_v52 = vpop.permute.xlu0 %1297 }
 0x22f   : > { %v1306_v55 = vrot.slane %v1298_v52, %v2119_v33 }
 0x231   : > { %v1557_v63 = vcombine.low %v1306_v55, %v1318_v56 }
 0x2e9   : > { %v1680_v2 = vpop.f32.mrb[16].mxu0 }
 0x2ea   : > { %v1040_v3 = vpop.f32.mrb[17].mxu0 }
 0x2eb   : > { %v1681_v5 = vpop.f32.mrb[18].mxu0 }
 0x2ec   : > { %v1104_v7 = vpack.c.bf16 %v1681_v5, %v1680_v2  ;;  %v1043_v8 = vpop.f32.mrb[19].mxu0  ;;  %v1556_v2 = vcombine.low %v1282_v57, %v1294_v58 }
 0x2ed   : > { %v1103_v12 = vpack.c.bf16 %v1043_v8, %v1040_v3  ;;  %v1383_v8 = vld [vmem:[%s2255_s6] sm:$0xf] }
 0x2ee   : > { %v1368_v13 = vadd.bf16 %v1551_v6, %v1104_v7 }
 0x2ef   : > { %v1367_v14 = vadd.bf16 %v1550_v9, %v1103_v12  ;;  %v1388_v9 = vpop.permute.xlu0 %1387 }
 0x2f0   : > { %v1376_v29 = vmax.bf16 %v1848_v10, %v1368_v13 }
 0x2f1   : > { %v1375_v20 = vmax.bf16 %v1848_v10, %v1367_v14  ;;  %v1684_v21 = vpop.f32.mrb[20].mxu0 }
 0x2f2   : > { %v1056_v22 = vpop.f32.mrb[21].mxu0 }
 0x2f3   : > { %v1685_v24 = vpop.f32.mrb[22].mxu0  ;;  %1695 = vmatpush3.bf16.msra.mxu1 %v1375_v20 }
 0x2f4   : > { %v1106_v26 = vpack.c.bf16 %v1685_v24, %v1684_v21  ;;  %v1059_v27 = vpop.f32.mrb[23].mxu0  ;;  %1696 = vmatprep.subr.bf16.mxu1 %v1850_v53 }
 0x2f5   : > { %v1105_v30 = vpack.c.bf16 %v1059_v27, %v1056_v22 }
 0x2f6   : > { %v1370_v31 = vadd.bf16 %v1553_v25, %v1106_v26 }
 0x2f7   : > { %v1369_v34 = vadd.bf16 %v1552_v28, %v1105_v30  ;;  %1697 = vmatpush3.bf16.msra.mxu1 %v1376_v29 }
 0x2f8   : > { %1698 = vmatprep.subr.bf16.mxu1 %v1850_v53  ;;  %v1378_v49 = vmax.bf16 %v1848_v10, %v1370_v31 }
 0x2f9   : > { %v1377_v40 = vmax.bf16 %v1848_v10, %v1369_v34  ;;  %v1688_v41 = vpop.f32.mrb[24].mxu0 }
 0x2fa   : > { %v1072_v42 = vpop.f32.mrb[25].mxu0 }
 0x2fb   : > { %v1689_v43 = vpop.f32.mrb[26].mxu0  ;;  %1699 = vmatpush3.bf16.msra.mxu1 %v1377_v40 }
 0x2fc   : > { %v1108_v45 = vpack.c.bf16 %v1689_v43, %v1688_v41  ;;  %v1075_v46 = vpop.f32.mrb[27].mxu0  ;;  %1700 = vmatprep.subr.bf16.mxu1 %v1850_v53 }
 0x2fd   : > { %v1107_v50 = vpack.c.bf16 %v1075_v46, %v1072_v42 }
 0x2fe   : > { %v1372_v51 = vadd.bf16 %v1555_v44, %v1108_v45 }
 0x2ff   : > { %v1371_v54 = vadd.bf16 %v1554_v47, %v1107_v50  ;;  %1701 = vmatpush3.bf16.msra.mxu1 %v1378_v49 }
 0x300   : > { %1702 = vmatprep.subr.bf16.mxu1 %v1850_v53  ;;  %v1380_v3 = vmax.bf16 %v1848_v10, %v1372_v51 }
 0x301   : > { %v1379_v59 = vmax.bf16 %v1848_v10, %v1371_v54  ;;  %v1692_v60 = vpop.f32.mrb[28].mxu0 }
 0x302   : > { %v1088_v61 = vpop.f32.mrb[29].mxu0 }
 0x303   : > { %v1693_v62 = vpop.f32.mrb[30].mxu0  ;;  %1703 = vmatpush3.bf16.msra.mxu1 %v1379_v59 }
 0x304   : > { %v1110_v0 = vpack.c.bf16 %v1693_v62, %v1692_v60  ;;  %v1091_v1 = vpop.f32.mrb[31].mxu0  ;;  %1704 = vmatprep.subr.bf16.mxu1 %v1850_v53 }
 0x305   : > { %v1109_v4 = vpack.c.bf16 %v1091_v1, %v1088_v61 }
 0x306   : > { %v1374_v5 = vadd.bf16 %v1557_v63, %v1110_v0 }
 0x307   : > { %v1373_v6 = vadd.bf16 %v1556_v2, %v1109_v4  ;;  %1705 = vmatpush3.bf16.msra.mxu1 %v1380_v3 }
 0x308   : > { %1706 = vmatprep.subr.bf16.mxu1 %v1850_v53  ;;  %v1382_v7 = vmax.bf16 %v1848_v10, %v1374_v5 }
 0x309   : > { %v1381_v33 = vmax.bf16 %v1848_v10, %v1373_v6 }
 0x30b   : > { %1707 = vmatpush3.bf16.msra.mxu1 %v1381_v33 }
 0x30c   : > { %1708 = vmatprep.subr.bf16.mxu1 %v1850_v53 }
 0x30f   : > { %1709 = vmatpush3.bf16.msra.mxu1 %v1382_v7 }
 0x312   : > { %1711 = vmatmul.mubr.bf16.vlgmr.msra.gmra.mrb[16].mxu1 %v1383_v8 }
 0x3e5   : > { %v1424_v11 = vpop.f32.mrb[16].mxu1 }
 0x3e6   : > { %v1425_v12 = vadd.f32 %v1424_v11, %v1388_v9  ;;  %v1712_v13 = vpop.f32.mrb[17].mxu1 }
 0x3e7   : > { %v1427_v10 = vpop.f32.mrb[18].mxu1 }
 0x3e8   : > { %1430 = vst [vmem:[%s296_s24] sm:$0xff] %v1425_v12  ;;  %v1713_v53 = vpop.f32.mrb[19].mxu1 }
 0x3e9   : > { %1797 = shalt.err (!%p1794_p3)
}
 0x3ea   : > { %s1798_s20 = scalar_lea.hbm %s2207_s12, 128  ;;  %s1802_s23 = scalar_lea.hbm %s2257_s8, 256 }
 0x3eb   : > { %p1799_p4 = scmp.ne.s32.totalorder %s2207_s12, %s1798_s20  ;;  %p1803_p9 = scmp.lt.u32.totalorder %s2207_s12, %s2257_s8 }
 0x3ec   : > { %p1804_p10 = scmp.lt.u32.totalorder %s1802_s23, %s1798_s20  ;;  %p1806_p12 = scmp.lt.u32.totalorder %s1798_s20, %s2207_s12 }
 0x3ed   : > { %p1800_p7 = pnand %p1799_p4, %p1936_p5 }
 0x3ee   : > { %p1805_p11 = por %p1804_p10, %p1803_p9 }
 0x3ef   : > { %p1801_p8 = pneg %p1800_p7 }
 0x3f0   : > { %p1807_p13 = por %p1806_p12, %p1805_p11 }
 0x3f2   : > { %p1808_p0 = pnand %p1807_p13, %p1801_p8 }
 0x3f4   : > { %1811 = shalt.err (!%p1808_p0)
}
 0x3f5   : > { %1715 = dma.vmem_to_hbm [thread:$0]  (%p1936_p5), %s2209_s25, 128, %s2207_s12, %s1432_s9  }
 0x3f6 PF: > { %p1721_p1 = scmp.ge.s32.totalorder %s1846_s30, 2  ;;  %s1457_s10 = sand.u32 1, %s1834_s27  }
 0x3f7   : > { %s1458_s13 = scalar_lea.sflag [#allocation3], %s1457_s10 }
 0x3f8   : > { %p1718_p2 = pnand %p1721_p1, %p1940_p6 }
 0x3fa   : > { %1829 = dma.done.wait (!%p1718_p2), %s1458_s13, 128  }
 0x3fb   : > { %1831 = vsyncadd (!%p1718_p2), %s1458_s13, 4294967168  ;;  %p18_p3 = scmp.ge.s32.totalorder %s1923_s11, 4   ;;  %s2260_s27 = smov %s1838_s28 }
 0x3fc   : > { %s2261_s28 = smov %s1842_s29  ;;  %s2262_s29 = smov %s1934_s14 }
 0x3fd   : > { %s2263_s30 = smov %s1923_s11  ;;  %20 = sbr.rel (!%p18_p3) target bundleno = 3 (0x3), region = 87 }
 0x404   :  { %1463 = vsyncpa [#allocation3], 1 }
 0x405   :  { %1465 = vsyncpa [#allocation3 + $0x1], 1 }

</bundles_post_ra>
